<compile_context>
chip_gen: v7x
topology: tpu7x:2x2x1
jax: 0.10.0
libtpu: 0.0.40
codegen_flags: <defaults>
</compile_context>

<pallas_src>
import functools

import jax
import jax.numpy as jnp
from jax import lax
from jax.experimental import pallas as pl
from jax.experimental.pallas import tpu as pltpu


def _dense_layer_kernel(x_ref, sb1_ref, w1b_ref, w2_ref, m_ref, out_ref,
                        *, W, HWg, Cout_pad):
    # x_ref:   (Cin+1, HWg)   channel-major, batch group flattened on lanes;
    #                         last channel is the constant bias channel.
    # sb1_ref: (Cin+1, 2)     col 0: BN1 scale, col 1: BN1 shift (aug: 0 / 1).
    # w1b_ref: (Cmid, Cin+1)  1x1 conv weight with BN2 scale folded in; last
    #                         column is the folded BN2 shift (bias-as-column).
    # w2_ref:  (9*Cout_pad, Cmid)  3x3 taps stacked along rows (t = kh*3+kw),
    #                         output channels zero-padded to a multiple of 8.
    # m_ref:   (9, 1, HWg)    per-tap boundary masks (1.0 / 0.0).
    # out_ref: (Cout_pad, HWg)

    # ---- BN1 + ReLU (augmented channel: 0*x + 1 -> all-ones bias row) ----
    x = x_ref[...]
    a = jnp.maximum(x * sb1_ref[:, 0:1] + sb1_ref[:, 1:2], 0.0)   # (Cin+1, HWg)

    # ---- 1x1 conv + BN2 (scale folded into w, shift via bias column) + ReLU ----
    z = jnp.maximum(
        jnp.dot(w1b_ref[...], a, preferred_element_type=jnp.float32), 0.0)

    # ---- 3x3 conv, stride 1, pad 1: one fused matmul over all 9 taps, then
    #      shift-accumulate per-tap results with lane rolls + boundary masks. ----
    r = jnp.dot(w2_ref[...], z, preferred_element_type=jnp.float32)  # (9*Cout_pad, HWg)

    m = m_ref[...]                                   # hoisted: single mask load
    acc = r[4 * Cout_pad:5 * Cout_pad, :]            # center tap: no shift/mask
    for kh in range(3):
        for kw in range(3):
            t = kh * 3 + kw
            if t == 4:
                continue
            d = (kh - 1) * W + (kw - 1)              # flat-index offset of tap
            tap = pltpu.roll(r[t * Cout_pad:(t + 1) * Cout_pad, :],
                             (-d) % HWg, 1)          # out[p] <- tap[p + d]
            acc = acc + tap * m[t]                   # zero wrapped / OOB taps
    out_ref[...] = acc


def _make_tap_masks(H, W, images_per_group):
    """(9, 1, ipg*H*W) float32 masks: 1.0 where the tap's source is in-bounds
    of the *same image* (also kills any roll wrap-around across images)."""
    idx = jnp.arange(H * W, dtype=jnp.int32)
    row = idx // W
    col = idx % W
    masks = []
    for kh in range(3):
        for kw in range(3):
            m = jnp.ones((H * W,), jnp.float32)
            if kh == 0:
                m = m * (row >= 1)
            elif kh == 2:
                m = m * (row <= H - 2)
            if kw == 0:
                m = m * (col >= 1)
            elif kw == 2:
                m = m * (col <= W - 2)
            masks.append(m)
    m = jnp.stack(masks, axis=0)                          # (9, HW)
    m = jnp.tile(m, (1, images_per_group))                # (9, ipg*HW)
    return m.reshape(9, 1, images_per_group * H * W)


def _tensorcores_per_chip():
    """Best-effort TensorCore-per-chip count (v7x / v4 / v5p -> 2, else 1)."""
    try:
        d = jax.devices()[0]
        if d.platform != "tpu":
            return 1
        kind = str(getattr(d, "device_kind", "")).lower()
        if ("v7" in kind) or ("7x" in kind) or ("v4" in kind) or ("v5p" in kind):
            return 2
    except Exception:
        pass
    return 1


def dense_layer_forward(x_nchw, params):
    """Pallas forward. x_nchw: (N, Cin, H, W) float32. Returns (N, Cout, H, W)."""
    eps = 1e-5
    N, Cin, H, W = x_nchw.shape
    Cmid = params["conv1_w"].shape[0]
    Cout = params["conv2_w"].shape[0]
    HW = H * W
    Cout_pad = ((Cout + 7) // 8) * 8

    # Fold BatchNorm (eval mode) into per-channel scale/shift.
    s1 = params["gamma1"] / jnp.sqrt(params["var1"] + eps)
    b1 = params["beta1"] - params["mean1"] * s1
    s2 = params["gamma2"] / jnp.sqrt(params["var2"] + eps)
    b2 = params["beta2"] - params["mean2"] * s2

    # BN1 scale/shift packed into one slab; augmented channel (scale 0, shift 1)
    # turns into the all-ones bias row after ReLU.
    s1a = jnp.concatenate([s1, jnp.zeros((1,), s1.dtype)])
    b1a = jnp.concatenate([b1, jnp.ones((1,), b1.dtype)])
    sb1 = jnp.stack([s1a, b1a], axis=1).astype(jnp.float32)        # (Cin+1, 2)

    # 1x1 conv weight with BN2 scale folded in, BN2 shift as bias column.
    w1 = params["conv1_w"].reshape(Cmid, Cin)
    w1b = jnp.concatenate([w1 * s2[:, None], b2[:, None]],
                          axis=1).astype(jnp.float32)              # (Cmid, Cin+1)

    # 3x3 conv taps stacked along rows; pad output channels to a multiple of 8
    # so every per-tap slice stays sublane-aligned (free view).
    w2 = params["conv2_w"]
    if Cout_pad != Cout:
        w2 = jnp.pad(w2, ((0, Cout_pad - Cout), (0, 0), (0, 0), (0, 0)))
    w2s = jnp.transpose(w2, (2, 3, 0, 1)).reshape(
        9 * Cout_pad, Cmid).astype(jnp.float32)                    # (9*Cout_pad, Cmid)

    # Grid: G = TensorCores per chip if they evenly split the batch (v7x -> 2),
    # otherwise a single step with the whole batch folded onto the lane axis.
    tc = _tensorcores_per_chip()
    G = tc if (1 <= tc <= N and N % tc == 0) else 1
    if G > 1 and ((N // G) * HW) % 128 != 0:
        G = 1
    ipg = N // G
    HWg = ipg * HW

    masks = _make_tap_masks(H, W, ipg)                             # (9, 1, HWg)

    # Channel-major layout with the whole batch on the lane axis, plus one
    # constant channel for the bias-as-column trick.
    x_t = jnp.transpose(x_nchw.reshape(N, Cin, HW),
                        (1, 0, 2)).reshape(Cin, N * HW)
    x_aug = jnp.concatenate(
        [x_t, jnp.zeros((1, N * HW), x_t.dtype)],
        axis=0).astype(jnp.float32)                                # (Cin+1, N*HW)

    kernel = functools.partial(_dense_layer_kernel,
                               W=W, HWg=HWg, Cout_pad=Cout_pad)

    out_flat = pl.pallas_call(
        kernel,
        out_shape=jax.ShapeDtypeStruct((Cout_pad, N * HW), jnp.float32),
        grid_spec=pltpu.PrefetchScalarGridSpec(
            num_scalar_prefetch=0,
            grid=(G,),
            in_specs=[
                pl.BlockSpec((Cin + 1, HWg), lambda g: (0, g)),
                pl.BlockSpec((Cin + 1, 2), lambda g: (0, 0)),
                pl.BlockSpec((Cmid, Cin + 1), lambda g: (0, 0)),
                pl.BlockSpec((9 * Cout_pad, Cmid), lambda g: (0, 0)),
                pl.BlockSpec((9, 1, HWg), lambda g: (0, 0, 0)),
            ],
            out_specs=pl.BlockSpec((Cout_pad, HWg), lambda g: (0, g)),
        ),
        compiler_params=pltpu.CompilerParams(
            dimension_semantics=("parallel",),
            vmem_limit_bytes=32 * 1024 * 1024),
    )(x_aug, sb1, w1b, w2s, masks)

    # (Cout_pad, N*HW) -> (N, Cout, H, W); lane axis is image-major, so this is
    # a reshape + tiny transpose + channel slice in the wrapper.
    out = out_flat.reshape(Cout_pad, N, H, W)[:Cout]
    return jnp.transpose(out, (1, 0, 2, 3))


def dense_layer_reference(x_nchw, params):
    """Pure-JAX reference matching PyTorch _DenseLayer (eval, drop_rate=0)."""
    eps = 1e-5

    def bn(x, gamma, beta, mean, var):
        return ((x - mean[None, :, None, None]) /
                jnp.sqrt(var[None, :, None, None] + eps)
                * gamma[None, :, None, None] + beta[None, :, None, None])

    x = jnp.maximum(bn(x_nchw, params["gamma1"], params["beta1"],
                       params["mean1"], params["var1"]), 0.0)
    x = lax.conv_general_dilated(x, params["conv1_w"], (1, 1), "VALID",
                                 dimension_numbers=("NCHW", "OIHW", "NCHW"))
    x = jnp.maximum(bn(x, params["gamma2"], params["beta2"],
                       params["mean2"], params["var2"]), 0.0)
    x = lax.conv_general_dilated(x, params["conv2_w"], (1, 1),
                                 ((1, 1), (1, 1)),
                                 dimension_numbers=("NCHW", "OIHW", "NCHW"))
    return x


def make_params(key, num_input_features, growth_rate, bn_size):
    cmid = bn_size * growth_rate
    ks = jax.random.split(key, 10)
    return {
        # BatchNorm2d(num_input_features)
        "gamma1": jax.random.uniform(ks[0], (num_input_features,),
                                     minval=0.5, maxval=1.5),
        "beta1": 0.1 * jax.random.normal(ks[1], (num_input_features,)),
        "mean1": 0.1 * jax.random.normal(ks[2], (num_input_features,)),
        "var1": jax.random.uniform(ks[3], (num_input_features,),
                                   minval=0.5, maxval=1.5),
        # Conv2d(num_input_features, bn_size*growth_rate, 1, bias=False)
        "conv1_w": 0.1 * jax.random.normal(
            ks[4], (cmid, num_input_features, 1, 1)),
        # BatchNorm2d(bn_size*growth_rate)
        "gamma2": jax.random.uniform(ks[5], (cmid,), minval=0.5, maxval=1.5),
        "beta2": 0.1 * jax.random.normal(ks[6], (cmid,)),
        "mean2": 0.1 * jax.random.normal(ks[7], (cmid,)),
        "var2": jax.random.uniform(ks[8], (cmid,), minval=0.5, maxval=1.5),
        # Conv2d(bn_size*growth_rate, growth_rate, 3, padding=1, bias=False)
        "conv2_w": 0.1 * jax.random.normal(ks[9], (growth_rate, cmid, 3, 3)),
    }


if __name__ == "__main__":
    # Module config: num_input_features=4, growth_rate=8, bn_size=4, drop_rate=0
    num_input_features, growth_rate, bn_size = 4, 8, 4
    N, H, W = 2, 16, 16

    key = jax.random.PRNGKey(0)
    k_x, k_p = jax.random.split(key)
    x = jax.random.normal(k_x, (N, num_input_features, H, W), dtype=jnp.float32)
    params = make_params(k_p, num_input_features, growth_rate, bn_size)

    out = jax.block_until_ready(dense_layer_forward(x, params))
    ref = jax.block_until_ready(dense_layer_reference(x, params))

    assert out.shape == (N, growth_rate, H, W), out.shape
    assert jnp.allclose(out, ref, atol=1e-4, rtol=1e-4), (
        float(jnp.max(jnp.abs(out - ref))))
    print("KERNEL_OK")
</pallas_src>

<mosaic_0001>
module attributes {stable_mosaic.version = 11 : i64} {
  func.func @_dense_layer_kernel(%arg0: i32, %arg1: memref<5x512xf32, #tpu.memory_space<vmem>>, %arg2: memref<5x2xf32, #tpu.memory_space<vmem>>, %arg3: memref<32x5xf32, #tpu.memory_space<vmem>>, %arg4: memref<72x32xf32, #tpu.memory_space<vmem>>, %arg5: memref<9x1x512xf32, #tpu.memory_space<vmem>>, %arg6: memref<8x512xf32, #tpu.memory_space<vmem>>) attributes {dimension_semantics = [#tpu.dimension_semantics<parallel>], iteration_bounds = array<i64: 1>, scalar_prefetch = 0 : i64, scratch_operands = 0 : i64, tpu.core_type = #tpu.core_type<tc>, window_params = [{transform_indices = @transform_0, window_bounds = array<i64: 5, 512>}, {pipeline_mode = #tpu.pipeline_mode<synchronous>, transform_indices = @transform_1, window_bounds = array<i64: 5, 2>}, {pipeline_mode = #tpu.pipeline_mode<synchronous>, transform_indices = @transform_2, window_bounds = array<i64: 32, 5>}, {pipeline_mode = #tpu.pipeline_mode<synchronous>, transform_indices = @transform_3, window_bounds = array<i64: 72, 32>}, {pipeline_mode = #tpu.pipeline_mode<synchronous>, transform_indices = @transform_4, window_bounds = array<i64: 9, 1, 512>}, {transform_indices = @transform_5, window_bounds = array<i64: 8, 512>}]} {
    %c0 = arith.constant 0 : index
    %c0_0 = arith.constant 0 : index
    %0 = vector.load %arg1[%c0, %c0_0] : memref<5x512xf32, #tpu.memory_space<vmem>>, vector<5x512xf32>
    %c0_1 = arith.constant 0 : index
    %c0_2 = arith.constant 0 : index
    %1 = vector.load %arg2[%c0_1, %c0_2] : memref<5x2xf32, #tpu.memory_space<vmem>>, vector<5x1xf32>
    %2 = vector.broadcast %1 : vector<5x1xf32> to vector<5x512xf32>
    %3 = arith.mulf %0, %2 : vector<5x512xf32>
    %c0_3 = arith.constant 0 : index
    %c1 = arith.constant 1 : index
    %4 = vector.load %arg2[%c0_3, %c1] : memref<5x2xf32, #tpu.memory_space<vmem>>, vector<5x1xf32>
    %5 = vector.broadcast %4 : vector<5x1xf32> to vector<5x512xf32>
    %6 = arith.addf %3, %5 : vector<5x512xf32>
    %cst = arith.constant 0.000000e+00 : f32
    %7 = vector.broadcast %cst : f32 to vector<5x512xf32>
    %8 = arith.maximumf %6, %7 : vector<5x512xf32>
    %c0_4 = arith.constant 0 : index
    %c0_5 = arith.constant 0 : index
    %9 = vector.load %arg3[%c0_4, %c0_5] : memref<32x5xf32, #tpu.memory_space<vmem>>, vector<32x5xf32>
    %cst_6 = arith.constant dense<0.000000e+00> : vector<32x512xf32>
    %10 = tpu.matmul %9, %8, %cst_6 {dimension_numbers = #tpu.dot_dimension_numbers<[1], [0], [0], [1], [0, 0, 1, 1], [], []>} : vector<32x5xf32>, vector<5x512xf32>, vector<32x512xf32> -> vector<32x512xf32>
    %cst_7 = arith.constant 0.000000e+00 : f32
    %11 = vector.broadcast %cst_7 : f32 to vector<32x512xf32>
    %12 = arith.maximumf %10, %11 : vector<32x512xf32>
    %c0_8 = arith.constant 0 : index
    %c0_9 = arith.constant 0 : index
    %13 = vector.load %arg4[%c0_8, %c0_9] : memref<72x32xf32, #tpu.memory_space<vmem>>, vector<72x32xf32>
    %cst_10 = arith.constant dense<0.000000e+00> : vector<72x512xf32>
    %14 = tpu.matmul %13, %12, %cst_10 {dimension_numbers = #tpu.dot_dimension_numbers<[1], [0], [0], [1], [0, 0, 1, 1], [], []>} : vector<72x32xf32>, vector<32x512xf32>, vector<72x512xf32> -> vector<72x512xf32>
    %c0_11 = arith.constant 0 : index
    %c0_12 = arith.constant 0 : index
    %c0_13 = arith.constant 0 : index
    %15 = vector.load %arg5[%c0_11, %c0_12, %c0_13] : memref<9x1x512xf32, #tpu.memory_space<vmem>>, vector<9x1x512xf32>
    %16 = vector.extract_strided_slice %14 {offsets = [32, 0], sizes = [8, 512], strides = [1, 1]} : vector<72x512xf32> to vector<8x512xf32>
    %17 = vector.extract_strided_slice %14 {offsets = [0, 0], sizes = [8, 512], strides = [1, 1]} : vector<72x512xf32> to vector<8x512xf32>
    %c17_i32 = arith.constant 17 : i32
    %18 = tpu.dynamic_rotate %17 by %c17_i32 dim 1 : vector<8x512xf32>, i32 -> vector<8x512xf32>
    %19 = vector.extract_strided_slice %15 {offsets = [0, 0, 0], sizes = [1, 1, 512], strides = [1, 1, 1]} : vector<9x1x512xf32> to vector<1x1x512xf32>
    %20 = vector.shape_cast %19 : vector<1x1x512xf32> to vector<1x512xf32>
    %21 = vector.broadcast %20 : vector<1x512xf32> to vector<8x512xf32>
    %22 = arith.mulf %18, %21 : vector<8x512xf32>
    %23 = arith.addf %16, %22 : vector<8x512xf32>
    %24 = vector.extract_strided_slice %14 {offsets = [8, 0], sizes = [8, 512], strides = [1, 1]} : vector<72x512xf32> to vector<8x512xf32>
    %c16_i32 = arith.constant 16 : i32
    %25 = tpu.dynamic_rotate %24 by %c16_i32 dim 1 : vector<8x512xf32>, i32 -> vector<8x512xf32>
    %26 = vector.extract_strided_slice %15 {offsets = [1, 0, 0], sizes = [1, 1, 512], strides = [1, 1, 1]} : vector<9x1x512xf32> to vector<1x1x512xf32>
    %27 = vector.shape_cast %26 : vector<1x1x512xf32> to vector<1x512xf32>
    %28 = vector.broadcast %27 : vector<1x512xf32> to vector<8x512xf32>
    %29 = arith.mulf %25, %28 : vector<8x512xf32>
    %30 = arith.addf %23, %29 : vector<8x512xf32>
    %31 = vector.extract_strided_slice %14 {offsets = [16, 0], sizes = [8, 512], strides = [1, 1]} : vector<72x512xf32> to vector<8x512xf32>
    %c15_i32 = arith.constant 15 : i32
    %32 = tpu.dynamic_rotate %31 by %c15_i32 dim 1 : vector<8x512xf32>, i32 -> vector<8x512xf32>
    %33 = vector.extract_strided_slice %15 {offsets = [2, 0, 0], sizes = [1, 1, 512], strides = [1, 1, 1]} : vector<9x1x512xf32> to vector<1x1x512xf32>
    %34 = vector.shape_cast %33 : vector<1x1x512xf32> to vector<1x512xf32>
    %35 = vector.broadcast %34 : vector<1x512xf32> to vector<8x512xf32>
    %36 = arith.mulf %32, %35 : vector<8x512xf32>
    %37 = arith.addf %30, %36 : vector<8x512xf32>
    %38 = vector.extract_strided_slice %14 {offsets = [24, 0], sizes = [8, 512], strides = [1, 1]} : vector<72x512xf32> to vector<8x512xf32>
    %c1_i32 = arith.constant 1 : i32
    %39 = tpu.dynamic_rotate %38 by %c1_i32 dim 1 : vector<8x512xf32>, i32 -> vector<8x512xf32>
    %40 = vector.extract_strided_slice %15 {offsets = [3, 0, 0], sizes = [1, 1, 512], strides = [1, 1, 1]} : vector<9x1x512xf32> to vector<1x1x512xf32>
    %41 = vector.shape_cast %40 : vector<1x1x512xf32> to vector<1x512xf32>
    %42 = vector.broadcast %41 : vector<1x512xf32> to vector<8x512xf32>
    %43 = arith.mulf %39, %42 : vector<8x512xf32>
    %44 = arith.addf %37, %43 : vector<8x512xf32>
    %45 = vector.extract_strided_slice %14 {offsets = [40, 0], sizes = [8, 512], strides = [1, 1]} : vector<72x512xf32> to vector<8x512xf32>
    %c511_i32 = arith.constant 511 : i32
    %46 = tpu.dynamic_rotate %45 by %c511_i32 dim 1 : vector<8x512xf32>, i32 -> vector<8x512xf32>
    %47 = vector.extract_strided_slice %15 {offsets = [5, 0, 0], sizes = [1, 1, 512], strides = [1, 1, 1]} : vector<9x1x512xf32> to vector<1x1x512xf32>
    %48 = vector.shape_cast %47 : vector<1x1x512xf32> to vector<1x512xf32>
    %49 = vector.broadcast %48 : vector<1x512xf32> to vector<8x512xf32>
    %50 = arith.mulf %46, %49 : vector<8x512xf32>
    %51 = arith.addf %44, %50 : vector<8x512xf32>
    %52 = vector.extract_strided_slice %14 {offsets = [48, 0], sizes = [8, 512], strides = [1, 1]} : vector<72x512xf32> to vector<8x512xf32>
    %c497_i32 = arith.constant 497 : i32
    %53 = tpu.dynamic_rotate %52 by %c497_i32 dim 1 : vector<8x512xf32>, i32 -> vector<8x512xf32>
    %54 = vector.extract_strided_slice %15 {offsets = [6, 0, 0], sizes = [1, 1, 512], strides = [1, 1, 1]} : vector<9x1x512xf32> to vector<1x1x512xf32>
    %55 = vector.shape_cast %54 : vector<1x1x512xf32> to vector<1x512xf32>
    %56 = vector.broadcast %55 : vector<1x512xf32> to vector<8x512xf32>
    %57 = arith.mulf %53, %56 : vector<8x512xf32>
    %58 = arith.addf %51, %57 : vector<8x512xf32>
    %59 = vector.extract_strided_slice %14 {offsets = [56, 0], sizes = [8, 512], strides = [1, 1]} : vector<72x512xf32> to vector<8x512xf32>
    %c496_i32 = arith.constant 496 : i32
    %60 = tpu.dynamic_rotate %59 by %c496_i32 dim 1 : vector<8x512xf32>, i32 -> vector<8x512xf32>
    %61 = vector.extract_strided_slice %15 {offsets = [7, 0, 0], sizes = [1, 1, 512], strides = [1, 1, 1]} : vector<9x1x512xf32> to vector<1x1x512xf32>
    %62 = vector.shape_cast %61 : vector<1x1x512xf32> to vector<1x512xf32>
    %63 = vector.broadcast %62 : vector<1x512xf32> to vector<8x512xf32>
    %64 = arith.mulf %60, %63 : vector<8x512xf32>
    %65 = arith.addf %58, %64 : vector<8x512xf32>
    %66 = vector.extract_strided_slice %14 {offsets = [64, 0], sizes = [8, 512], strides = [1, 1]} : vector<72x512xf32> to vector<8x512xf32>
    %c495_i32 = arith.constant 495 : i32
    %67 = tpu.dynamic_rotate %66 by %c495_i32 dim 1 : vector<8x512xf32>, i32 -> vector<8x512xf32>
    %68 = vector.extract_strided_slice %15 {offsets = [8, 0, 0], sizes = [1, 1, 512], strides = [1, 1, 1]} : vector<9x1x512xf32> to vector<1x1x512xf32>
    %69 = vector.shape_cast %68 : vector<1x1x512xf32> to vector<1x512xf32>
    %70 = vector.broadcast %69 : vector<1x512xf32> to vector<8x512xf32>
    %71 = arith.mulf %67, %70 : vector<8x512xf32>
    %72 = arith.addf %65, %71 : vector<8x512xf32>
    %c0_14 = arith.constant 0 : index
    %c0_15 = arith.constant 0 : index
    %73 = vector.load %arg6[%c0_14, %c0_15] : memref<8x512xf32, #tpu.memory_space<vmem>>, vector<8x512xf32>
    tpu.vector_store %arg6[%c0_14, %c0_15], %72 {strides = array<i32>} : memref<8x512xf32, #tpu.memory_space<vmem>>, vector<8x512xf32>,
    return
  }
  func.func @transform_0(%arg0: i32) -> (i32, i32) {
    %c0_i32 = arith.constant 0 : i32
    %c0_i32_0 = arith.constant 0 : i32
    return %c0_i32, %arg0 : i32, i32
  }
  func.func @transform_1(%arg0: i32) -> (i32, i32) {
    %c0_i32 = arith.constant 0 : i32
    %c0_i32_0 = arith.constant 0 : i32
    %c0_i32_1 = arith.constant 0 : i32
    return %c0_i32, %c0_i32_0 : i32, i32
  }
  func.func @transform_2(%arg0: i32) -> (i32, i32) {
    %c0_i32 = arith.constant 0 : i32
    %c0_i32_0 = arith.constant 0 : i32
    %c0_i32_1 = arith.constant 0 : i32
    return %c0_i32, %c0_i32_0 : i32, i32
  }
  func.func @transform_3(%arg0: i32) -> (i32, i32) {
    %c0_i32 = arith.constant 0 : i32
    %c0_i32_0 = arith.constant 0 : i32
    %c0_i32_1 = arith.constant 0 : i32
    return %c0_i32, %c0_i32_0 : i32, i32
  }
  func.func @transform_4(%arg0: i32) -> (i32, i32, i32) {
    %c0_i32 = arith.constant 0 : i32
    %c0_i32_0 = arith.constant 0 : i32
    %c0_i32_1 = arith.constant 0 : i32
    %c0_i32_2 = arith.constant 0 : i32
    return %c0_i32, %c0_i32_0, %c0_i32_1 : i32, i32, i32
  }
  func.func @transform_5(%arg0: i32) -> (i32, i32) {
    %c0_i32 = arith.constant 0 : i32
    %c0_i32_0 = arith.constant 0 : i32
    return %c0_i32, %arg0 : i32, i32
  }
}

</mosaic_0001>

<bundles_post_ra>
// kernel: tpu_custom_call.1
= control target key start
LH: loop header
LB: loop body
LE: loop exit
PB: predicated region body
PF: predicated region fallthrough
CT: control target
= control target key end

     0   :  { %s1479_s0 = inlined_call_operand.vmem [shape: f32[5,512], index: 0, kind: input, shape index: {}]   ;;  %s1480_s1 = inlined_call_operand.vmem [shape: f32[5,2], index: 1, kind: input, shape index: {}]   ;;  %s1481_s2 = inlined_call_operand.vmem [shape: f32[32,5], index: 2, kind: input, shape index: {}]   ;;  %s1482_s3 = inlined_call_operand.vmem [shape: f32[72,32], index: 3, kind: input, shape index: {}]   ;;  %s1483_s4 = inlined_call_operand.vmem [shape: f32[9,1,512], index: 4, kind: input, shape index: {}]   ;;  %s1484_s5 = inlined_call_operand.hbm [shape: f32[8,512], index: 5, kind: output, shape index: {}]  }
   0x1   :  { %v25_v0 = vld [vmem:[%s1480_s1] sm:$0x1f] }
   0x2   :  { %10 = vsyncpa [#allocation3], 0  ;;  %v994_v1 = vmov 0   ;;  %v995_v2 = vmov 1   ;;  %v996_v3 = vmov 0.0   ;;  %vm64_vm0 = vcmask 1044480  }
   0x3   :  { %968 = vset.pattern.permute.xlu0 %v994_v1  ;;  %141 = vmatprep.mubr.f32.mxu0 %v996_v3  ;;  %v21_v5 = vld [vmem:[%s1479_s0] sm:$0x1f]  ;;  %v23_v6 = vld [vmem:[%s1479_s0 + $0x10] sm:$0x1f]  ;;  %v22_v7 = vld [vmem:[%s1479_s0 + $0x8] sm:$0x1f] }
   0x4   :  { %28 = vperm.xlu0 %968, %v25_v0   ;;  %230 = vmatprep.mubr.f32.mxu1 %v996_v3  ;;  %v24_v8 = vld [vmem:[%s1479_s0 + $0x18] sm:$0x1f]  ;;  %v47_v22 = vld [vmem:[%s1481_s2] sm:$0xff]  ;;  %vm51_vm1 = vcmask 39936   ;;  %v48_v23 = vld [vmem:[%s1481_s2 + $0x8] sm:$0xff]  ;;  %vm280_vm2 = vcmask 261120  }
   0x5   :  { %v49_v24 = vld [vmem:[%s1481_s2 + $0x10] sm:$0xff]  ;;  %v50_v25 = vld [vmem:[%s1481_s2 + $0x18] sm:$0xff]  ;;  %s997_s25 = smov 17   ;;  %s998_s26 = smov 16  }
   0x6   :  { %s1000_s27 = smov 1   ;;  %s1001_s28 = smov 127  }
   0x7   :  { %s1002_s0 = smov 113   ;;  %s1003_s29 = smov 112  }
   0x8   :  { %969 = vset.pattern.permute.xlu0 %v995_v2  ;;  %v271_v2 = vld [vmem:[%s1482_s3] sm:$0xff]  ;;  %s1004_s30 = smov 111  }
   0x9   :  { %36 = vperm.xlu0 %969, %v25_v0  }
  0x83   :  { %v29_v4 = vpop.permute.xlu0 %28 }
  0x84   :  { %v31_v9 = vmul.f32 %v29_v4, %v21_v5  ;;  %v33_v10 = vmul.f32 %v29_v4, %v23_v6  ;;  %v32_v11 = vmul.f32 %v29_v4, %v22_v7  ;;  %v34_v12 = vmul.f32 %v29_v4, %v24_v8  ;;  %v272_v4 = vld [vmem:[%s1482_s3 + $0x8] sm:$0xff]  ;;  %v273_v5 = vld [vmem:[%s1482_s3 + $0x10] sm:$0xff]  ;;  %v274_v6 = vld [vmem:[%s1482_s3 + $0x18] sm:$0xff] }
  0x85   :  { %v275_v7 = vld [vmem:[%s1482_s3 + $0x20] sm:$0xff]  ;;  %v276_v8 = vld [vmem:[%s1482_s3 + $0x28] sm:$0xff] }
  0x88   :  { %v37_v13 = vpop.permute.xlu0 %36 }
  0x89   :  { %v40_v14 = vadd.f32 %v37_v13, %v32_v11  ;;  %v42_v15 = vadd.f32 %v37_v13, %v34_v12  ;;  %v39_v16 = vadd.f32 %v37_v13, %v31_v9  ;;  %v41_v17 = vadd.f32 %v37_v13, %v33_v10  ;;  %v277_v9 = vld [vmem:[%s1482_s3 + $0x30] sm:$0xff]  ;;  %v278_v10 = vld [vmem:[%s1482_s3 + $0x38] sm:$0xff]  ;;  %v279_v11 = vld [vmem:[%s1482_s3 + $0x40] sm:$0xff]  ;;  %s999_s3 = smov 15  }
  0x8b   :  { %v44_v18 = vmax.f32 %v40_v14, 0.0  ;;  %v46_v19 = vmax.f32 %v42_v15, 0.0  ;;  %v43_v20 = vmax.f32 %v39_v16, 0.0  ;;  %v45_v21 = vmax.f32 %v41_v17, 0.0 }
  0x8d   :  { %910 = vmatprep.subr.msk.mxu0 %vm64_vm0, %v44_v18  ;;  %916 = vmatprep.subr.msk.mxu1 %vm64_vm0, %v46_v19 }
  0x8e   :  { %911 = vmatpush1.msk.msra.mxu0 %vm64_vm0, %v43_v20  ;;  %917 = vmatpush1.msk.msra.mxu1 %vm64_vm0, %v45_v21 }
  0x8f   :  { %912 = vmatmul.mubr.msk.f32.vlgmr.msra.gmra.mrb[0].mxu0 %vm51_vm1, %v47_v22  ;;  %918 = vmatmul.mubr.msk.f32.vlgmr.msra.gmra.mrb[0].mxu1 %vm51_vm1, %v47_v22 }
  0x90   :  { %147 = vmatprep.mubr.f32.mxu0 %v996_v3  ;;  %236 = vmatprep.mubr.f32.mxu1 %v996_v3 }
  0x93   :  { %913 = vmatmul.mubr.msk.f32.gmra.mrb[2].mxu0 %vm51_vm1, %v48_v23  ;;  %919 = vmatmul.mubr.msk.f32.gmra.mrb[2].mxu1 %vm51_vm1, %v48_v23 }
  0x94   :  { %153 = vmatprep.mubr.f32.mxu0 %v996_v3  ;;  %242 = vmatprep.mubr.f32.mxu1 %v996_v3 }
  0x97   :  { %914 = vmatmul.mubr.msk.f32.gmra.mrb[4].mxu0 %vm51_vm1, %v49_v24  ;;  %920 = vmatmul.mubr.msk.f32.gmra.mrb[4].mxu1 %vm51_vm1, %v49_v24 }
  0x98   :  { %159 = vmatprep.mubr.f32.mxu0 %v996_v3  ;;  %248 = vmatprep.mubr.f32.mxu1 %v996_v3 }
  0x9b   :  { %915 = vmatmul.mubr.msk.f32.gmra.mrb[6].mxu0 %vm51_vm1, %v50_v25  ;;  %921 = vmatmul.mubr.msk.f32.gmra.mrb[6].mxu1 %vm51_vm1, %v50_v25 }
  0x9c   :  { %372 = vmatprep.mubr.f32.mxu0 %v996_v3  ;;  %491 = vmatprep.mubr.f32.mxu1 %v996_v3 }
 0x162   :  { %v143_v26 = vpop.f32.mrb[0].mxu0  ;;  %v232_v27 = vpop.f32.mrb[0].mxu1 }
 0x163   :  { %v145_v28 = vpop.f32.mrb[1].mxu0  ;;  %v234_v29 = vpop.f32.mrb[1].mxu1  ;;  %v257_v30 = vmax.f32 %v232_v27, 0.0  ;;  %v255_v34 = vmax.f32 %v143_v26, 0.0 }
 0x164   :  { %v258_v31 = vmax.f32 %v234_v29, 0.0  ;;  %v256_v39 = vmax.f32 %v145_v28, 0.0 }
 0x166   :  { %v149_v32 = vpop.f32.mrb[2].mxu0  ;;  %v238_v33 = vpop.f32.mrb[2].mxu1 }
 0x167   :  { %v259_v35 = vmax.f32 %v149_v32, 0.0  ;;  %v261_v36 = vmax.f32 %v238_v33, 0.0  ;;  %v151_v37 = vpop.f32.mrb[3].mxu0  ;;  %v240_v38 = vpop.f32.mrb[3].mxu1 }
 0x168   :  { %v260_v40 = vmax.f32 %v151_v37, 0.0  ;;  %v262_v41 = vmax.f32 %v240_v38, 0.0 }
 0x169   :  { %v942_v42 = vpack.c.bf16 %v259_v35, %v255_v34  ;;  %v950_v43 = vpack.c.bf16 %v261_v36, %v257_v30 }
 0x16a   :  { %v940_v44 = vpack.c.bf16 %v260_v40, %v256_v39  ;;  %v948_v45 = vpack.c.bf16 %v262_v41, %v258_v31  ;;  %v155_v46 = vpop.f32.mrb[4].mxu0  ;;  %v244_v47 = vpop.f32.mrb[4].mxu1 }
 0x16b   :  { %v157_v48 = vpop.f32.mrb[5].mxu0  ;;  %v246_v49 = vpop.f32.mrb[5].mxu1  ;;  %v265_v50 = vmax.f32 %v244_v47, 0.0  ;;  %v263_v54 = vmax.f32 %v155_v46, 0.0 }
 0x16c   :  { %941 = vmatprep.subr.bf16.mxu0 %v940_v44  ;;  %949 = vmatprep.subr.bf16.mxu1 %v948_v45  ;;  %v266_v51 = vmax.f32 %v246_v49, 0.0  ;;  %v264_v59 = vmax.f32 %v157_v48, 0.0 }
 0x16d   :  { %943 = vmatpush1.bf16.msra.mxu0 %v942_v42  ;;  %951 = vmatpush1.bf16.msra.mxu1 %v950_v43 }
 0x16e   :  { %v161_v52 = vpop.f32.mrb[6].mxu0  ;;  %v250_v53 = vpop.f32.mrb[6].mxu1 }
 0x16f   :  { %v267_v55 = vmax.f32 %v161_v52, 0.0  ;;  %v269_v56 = vmax.f32 %v250_v53, 0.0  ;;  %v163_v57 = vpop.f32.mrb[7].mxu0  ;;  %v252_v58 = vpop.f32.mrb[7].mxu1 }
 0x170   :  { %v268_v60 = vmax.f32 %v163_v57, 0.0  ;;  %v270_v61 = vmax.f32 %v252_v58, 0.0  ;;  %v562_v58 = vlaneseq }
 0x171   :  { %v946_v62 = vpack.c.bf16 %v267_v55, %v263_v54  ;;  %v954_v63 = vpack.c.bf16 %v269_v56, %v265_v50 }
 0x172   :  { %v944_v0 = vpack.c.bf16 %v268_v60, %v264_v59  ;;  %v952_v1 = vpack.c.bf16 %v270_v61, %v266_v51  ;;  %v571_v61 = vshrl.u32 %v562_v58, 7 }
 0x174   :  { %945 = vmatprep.subr.bf16.mxu0 %v944_v0  ;;  %953 = vmatprep.subr.bf16.mxu1 %v952_v1  ;;  %v1172_v0 = vand.u32 127, %v562_v58  ;;  %v1174_v1 = vsub.s32 0, %v571_v61 }
 0x175   :  { %947 = vmatpush1.bf16.msra.mxu0 %v946_v62  ;;  %955 = vmatpush1.bf16.msra.mxu1 %v954_v63 }
 0x176   :  { %vm564_vm3 = vcmp.lt.s32.totalorder %v1172_v0, 17  ;;  %vm606_vm4 = vcmp.lt.s32.totalorder %v1172_v0, 16  ;;  %vm648_vm5 = vcmp.lt.s32.totalorder %v1172_v0, 15  ;;  %vm690_vm6 = vcmp.lt.s32.totalorder %v1172_v0, 1 }
 0x177   :  { %vm732_vm7 = vcmp.lt.s32.totalorder %v1172_v0, 127  ;;  %vm774_vm8 = vcmp.lt.s32.totalorder %v1172_v0, 113  ;;  %vm816_vm9 = vcmp.lt.s32.totalorder %v1172_v0, 112  ;;  %vm858_vm10 = vcmp.lt.s32.totalorder %v1172_v0, 111 }
 0x178   :  { %922 = vmatmul.mubr.msk.f32.vlgmr.msra.gmra.mrb[8].mxu0 %vm280_vm2, %v271_v2  ;;  %931 = vmatmul.mubr.msk.f32.vlgmr.msra.gmra.mrb[8].mxu1 %vm280_vm2, %v271_v2  ;;  %v1176_v2 = vsub.s32 3, %v571_v61 }
 0x179   :  { %378 = vmatprep.mubr.f32.mxu0 %v996_v3  ;;  %497 = vmatprep.mubr.f32.mxu1 %v996_v3 }
 0x17c   :  { %923 = vmatmul.mubr.msk.f32.gmra.mrb[10].mxu0 %vm280_vm2, %v272_v4  ;;  %932 = vmatmul.mubr.msk.f32.gmra.mrb[10].mxu1 %vm280_vm2, %v272_v4  ;;  %v1178_v4 = vsub.s32 1, %v571_v61 }
 0x17d   :  { %384 = vmatprep.mubr.f32.mxu0 %v996_v3  ;;  %503 = vmatprep.mubr.f32.mxu1 %v996_v3 }
 0x180   :  { %924 = vmatmul.mubr.msk.f32.gmra.mrb[12].mxu0 %vm280_vm2, %v273_v5  ;;  %933 = vmatmul.mubr.msk.f32.gmra.mrb[12].mxu1 %vm280_vm2, %v273_v5 }
 0x181   :  { %390 = vmatprep.mubr.f32.mxu0 %v996_v3  ;;  %509 = vmatprep.mubr.f32.mxu1 %v996_v3 }
 0x184   :  { %925 = vmatmul.mubr.msk.f32.gmra.mrb[14].mxu0 %vm280_vm2, %v274_v6  ;;  %934 = vmatmul.mubr.msk.f32.gmra.mrb[14].mxu1 %vm280_vm2, %v274_v6  ;;  %v546_v6 = vld [vmem:[%s1483_s4] sm:$0xf] }
 0x185   :  { %396 = vmatprep.mubr.f32.mxu0 %v996_v3  ;;  %515 = vmatprep.mubr.f32.mxu1 %v996_v3 }
 0x188   :  { %926 = vmatmul.mubr.msk.f32.gmra.mrb[16].mxu0 %vm280_vm2, %v275_v7  ;;  %935 = vmatmul.mubr.msk.f32.gmra.mrb[16].mxu1 %vm280_vm2, %v275_v7  ;;  %v1185_v7 = vsub.s32 2, %v571_v61 }
 0x189   :  { %402 = vmatprep.mubr.f32.mxu0 %v996_v3  ;;  %521 = vmatprep.mubr.f32.mxu1 %v996_v3 }
 0x18c   :  { %927 = vmatmul.mubr.msk.f32.gmra.mrb[18].mxu0 %vm280_vm2, %v276_v8  ;;  %936 = vmatmul.mubr.msk.f32.gmra.mrb[18].mxu1 %vm280_vm2, %v276_v8  ;;  %v1190_v8 = vld [vmem:[%s1483_s4 + $0x4] sm:$0xf] }
 0x18d   :  { %408 = vmatprep.mubr.f32.mxu0 %v996_v3  ;;  %527 = vmatprep.mubr.f32.mxu1 %v996_v3 }
 0x190   :  { %928 = vmatmul.mubr.msk.f32.gmra.mrb[20].mxu0 %vm280_vm2, %v277_v9  ;;  %937 = vmatmul.mubr.msk.f32.gmra.mrb[20].mxu1 %vm280_vm2, %v277_v9  ;;  %v1195_v9 = vld [vmem:[%s1483_s4 + $0x8] sm:$0xf] }
 0x191   :  { %414 = vmatprep.mubr.f32.mxu0 %v996_v3  ;;  %533 = vmatprep.mubr.f32.mxu1 %v996_v3 }
 0x194   :  { %929 = vmatmul.mubr.msk.f32.gmra.mrb[22].mxu0 %vm280_vm2, %v278_v10  ;;  %938 = vmatmul.mubr.msk.f32.gmra.mrb[22].mxu1 %vm280_vm2, %v278_v10 }
 0x195   :  { %420 = vmatprep.mubr.f32.mxu0 %v996_v3  ;;  %539 = vmatprep.mubr.f32.mxu1 %v996_v3 }
 0x198   :  { %930 = vmatmul.mubr.msk.f32.gmra.mrb[24].mxu0 %vm280_vm2, %v279_v11  ;;  %939 = vmatmul.mubr.msk.f32.gmra.mrb[24].mxu1 %vm280_vm2, %v279_v11  ;;  %v573_v11 = vrot.slane %v546_v6, %v1174_v1 }
 0x24b   :  { %v374_v12 = vpop.f32.mrb[8].mxu0  ;;  %v493_v13 = vpop.f32.mrb[8].mxu1 }
 0x24c   :  { %v495_v14 = vpop.f32.mrb[9].mxu1  ;;  %554 = vrot.lane.b32.xlu1 %v374_v12, %s997_s25  ;;  %v376_v15 = vpop.f32.mrb[9].mxu0  ;;  %v585_v12 = vrot.slane %v546_v6, %v1176_v2 }
 0x24d   :  { %560 = vrot.lane.b32.xlu0 %v495_v14, %s997_s25 }
 0x24f   :  { %v380_v16 = vpop.f32.mrb[10].mxu0  ;;  %v499_v17 = vpop.f32.mrb[10].mxu1 }
 0x250   :  { %558 = vrot.lane.b32.xlu1 %v493_v13, %s997_s25  ;;  %v382_v18 = vpop.f32.mrb[11].mxu0  ;;  %v501_v19 = vpop.f32.mrb[11].mxu1  ;;  %v577_v13 = vrot.slane %v546_v6, %v1178_v4 }
 0x251   :  { %600 = vrot.lane.b32.xlu0 %v382_v18, %s998_s26  ;;  %v1214_v18 = vld [vmem:[%s1483_s4 + $0xc] sm:$0xf] }
 0x253   :  { %v386_v20 = vpop.f32.mrb[12].mxu0  ;;  %v505_v3 = vpop.f32.mrb[12].mxu1 }
 0x254   :  { %556 = vrot.lane.b32.xlu1 %v376_v15, %s997_s25  ;;  %v388_v21 = vpop.f32.mrb[13].mxu0  ;;  %v507_v22 = vpop.f32.mrb[13].mxu1  ;;  %v581_v15 = vrot.slane %v546_v6, %v1185_v7 }
 0x255   :  { %604 = vrot.lane.b32.xlu0 %v501_v19, %s998_s26  ;;  %v623_v19 = vrot.slane %v1190_v8, %v1185_v7 }
 0x257   :  { %v392_v23 = vpop.f32.mrb[14].mxu0  ;;  %v511_v24 = vpop.f32.mrb[14].mxu1 }
 0x258   :  { %598 = vrot.lane.b32.xlu1 %v380_v16, %s998_s26  ;;  %v394_v25 = vpop.f32.mrb[15].mxu0  ;;  %v513_v26 = vpop.f32.mrb[15].mxu1  ;;  %v619_v16 = vrot.slane %v1190_v8, %v1178_v4 }
 0x259   :  { %642 = vrot.lane.b32.xlu0 %v388_v21, %s999_s3  ;;  %v1226_v21 = vld [vmem:[%s1483_s4 + $0x14] sm:$0xf] }
 0x25b   :  { %v1142_v27 = vpop.f32.mrb[16].mxu0  ;;  %v1144_v28 = vpop.f32.mrb[16].mxu1 }
 0x25c   :  { %602 = vrot.lane.b32.xlu1 %v499_v17, %s998_s26  ;;  %v1146_v29 = vpop.f32.mrb[17].mxu0  ;;  %v1148_v30 = vpop.f32.mrb[17].mxu1  ;;  %v615_v17 = vrot.slane %v1190_v8, %v1174_v1 }
 0x25d   :  { %646 = vrot.lane.b32.xlu0 %v507_v22, %s999_s3  ;;  %v657_v22 = vrot.slane %v1195_v9, %v1174_v1 }
 0x25f   :  { %v404_v31 = vpop.f32.mrb[18].mxu0  ;;  %v523_v32 = vpop.f32.mrb[18].mxu1 }
 0x260   :  { %640 = vrot.lane.b32.xlu1 %v386_v20, %s999_s3  ;;  %v406_v33 = vpop.f32.mrb[19].mxu0  ;;  %v525_v34 = vpop.f32.mrb[19].mxu1  ;;  %v627_v20 = vrot.slane %v1190_v8, %v1176_v2 }
 0x261   :  { %684 = vrot.lane.b32.xlu0 %v394_v25, %s1000_s27 }
 0x263   :  { %v410_v35 = vpop.f32.mrb[20].mxu0  ;;  %v529_v36 = vpop.f32.mrb[20].mxu1 }
 0x264   :  { %644 = vrot.lane.b32.xlu1 %v505_v3, %s999_s3  ;;  %v412_v37 = vpop.f32.mrb[21].mxu0  ;;  %v531_v38 = vpop.f32.mrb[21].mxu1  ;;  %v661_v3 = vrot.slane %v1195_v9, %v1178_v4 }
 0x265   :  { %688 = vrot.lane.b32.xlu0 %v513_v26, %s1000_s27  ;;  %v1240_v26 = vld [vmem:[%s1483_s4 + $0x18] sm:$0xf] }
 0x266   :  { %v795_v58 = vrot.slane %v1240_v26, %v1176_v2 }
 0x267   :  { %v416_v39 = vpop.f32.mrb[22].mxu0  ;;  %v535_v40 = vpop.f32.mrb[22].mxu1 }
 0x268   :  { %682 = vrot.lane.b32.xlu1 %v392_v23, %s1000_s27  ;;  %v418_v41 = vpop.f32.mrb[23].mxu0  ;;  %v537_v42 = vpop.f32.mrb[23].mxu1  ;;  %v665_v23 = vrot.slane %v1195_v9, %v1185_v7 }
 0x269   :  { %726 = vrot.lane.b32.xlu0 %v406_v33, %s1001_s28  ;;  %v707_v33 = vrot.slane %v1214_v18, %v1185_v7 }
 0x26b   :  { %v422_v43 = vpop.f32.mrb[24].mxu0  ;;  %v541_v44 = vpop.f32.mrb[24].mxu1 }
 0x26c   :  { %686 = vrot.lane.b32.xlu1 %v511_v24, %s1000_s27  ;;  %v424_v45 = vpop.f32.mrb[25].mxu0  ;;  %v543_v46 = vpop.f32.mrb[25].mxu1  ;;  %v669_v24 = vrot.slane %v1195_v9, %v1176_v2 }
 0x26d   :  { %730 = vrot.lane.b32.xlu0 %v525_v34, %s1001_s28  ;;  %v711_v34 = vrot.slane %v1214_v18, %v1176_v2 }
 0x270   :  { %724 = vrot.lane.b32.xlu1 %v404_v31, %s1001_s28  ;;  %v703_v31 = vrot.slane %v1214_v18, %v1178_v4 }
 0x271   :  { %768 = vrot.lane.b32.xlu0 %v412_v37, %s1002_s0  ;;  %v741_v37 = vrot.slane %v1226_v21, %v1174_v1 }
 0x274   :  { %728 = vrot.lane.b32.xlu1 %v523_v32, %s1001_s28  ;;  %v699_v32 = vrot.slane %v1214_v18, %v1174_v1 }
 0x275   :  { %772 = vrot.lane.b32.xlu0 %v531_v38, %s1002_s0  ;;  %v753_v38 = vrot.slane %v1226_v21, %v1176_v2 }
 0x278   :  { %766 = vrot.lane.b32.xlu1 %v410_v35, %s1002_s0 }
 0x279   :  { %810 = vrot.lane.b32.xlu0 %v418_v41, %s1003_s29 }
 0x27c   :  { %770 = vrot.lane.b32.xlu1 %v529_v36, %s1002_s0 }
 0x27d   :  { %814 = vrot.lane.b32.xlu0 %v537_v42, %s1003_s29 }
 0x280   :  { %808 = vrot.lane.b32.xlu1 %v416_v39, %s1003_s29  ;;  %v745_v39 = vrot.slane %v1226_v21, %v1178_v4 }
 0x281   :  { %852 = vrot.lane.b32.xlu0 %v424_v45, %s1004_s30 }
 0x284   :  { %812 = vrot.lane.b32.xlu1 %v535_v40, %s1003_s29  ;;  %v1264_v40 = vld [vmem:[%s1483_s4 + $0x1c] sm:$0xf] }
 0x285   :  { %856 = vrot.lane.b32.xlu0 %v543_v46, %s1004_s30  ;;  %v825_v8 = vrot.slane %v1264_v40, %v1174_v1 }
 0x288   :  { %850 = vrot.lane.b32.xlu1 %v422_v43, %s1004_s30 }
 0x28c   :  { %854 = vrot.lane.b32.xlu1 %v541_v44, %s1004_s30  ;;  %v783_v44 = vrot.slane %v1240_v26, %v1174_v1 }
 0x2be   :  { %v555_v47 = vpop.permute.xlu1 %554 }
 0x2bf   :  { %v561_v48 = vpop.permute.xlu0 %560 }
 0x2c0   :  { %v568_v36 = vsel %vm564_vm3, %v561_v48, %v555_v47 }
 0x2c1   :  { %v590_v61 = vmul.f32 %v573_v11, %v568_v36 }
 0x2c2   :  { %v559_v49 = vpop.permute.xlu1 %558 }
 0x2c3   :  { %v1150_v50 = vpop.permute.xlu0 %600  ;;  %v565_v41 = vsel %vm564_vm3, %v559_v49, %v561_v48 }
 0x2c4   :  { %v593_v48 = vmul.f32 %v585_v12, %v565_v41 }
 0x2c6   :  { %v557_v51 = vpop.permute.xlu1 %556 }
 0x2c7   :  { %v1152_v52 = vpop.permute.xlu0 %604  ;;  %v567_v42 = vsel %vm564_vm3, %v555_v47, %v557_v51  ;;  %v566_v45 = vsel %vm564_vm3, %v557_v51, %v559_v49 }
 0x2c8   :  { %v591_v47 = vmul.f32 %v577_v13, %v567_v42  ;;  %v592_v43 = vmul.f32 %v581_v15, %v566_v45  ;;  %v594_v45 = vadd.f32 %v590_v61, %v1142_v27 }
 0x2ca   :  { %v1154_v53 = vpop.permute.xlu1 %598 }
 0x2cb   :  { %v1156_v54 = vpop.permute.xlu0 %642  ;;  %v609_v6 = vsel %vm606_vm4, %v1154_v53, %v1150_v50  ;;  %v610_v49 = vsel %vm606_vm4, %v1152_v52, %v1154_v53  ;;  %v1306_v53 = vld [vmem:[%s1483_s4 + $0x20] sm:$0xf]  ;;  %s1005_s4 = smov [#allocation2]  }
 0x2cc   :  { %v633_v41 = vmul.f32 %v619_v16, %v609_v6  ;;  %v632_v42 = vmul.f32 %v615_v17, %v610_v49  ;;  %v867_v16 = vrot.slane %v1306_v53, %v1174_v1  ;;  %v597_v6 = vadd.f32 %v593_v48, %v1148_v30  ;;  %s902_s21 = sshll.u32 %s1005_s4, 4  ;;  %s903_s21 = int_to_ptr.vmem [resolvable:$true] %s902_s21 }
 0x2cd   :  { %v595_v49 = vadd.f32 %v591_v47, %v1146_v29  ;;  %v596_v29 = vadd.f32 %v592_v43, %v1144_v28  ;;  %s970_s22 = scalar_lea.vmem %s903_s21, 512  ;;  %p975_p1 = scmp.lt.s32.totalorder %s903_s21, %s903_s21 }
 0x2ce   :  { %v1158_v55 = vpop.permute.xlu1 %602  ;;  %v636_v48 = vadd.f32 %v632_v42, %v594_v45  ;;  %v1485_v45 = vrot.slane %v1226_v21, %v1185_v7  ;;  %p971_p0 = scmp.ne.s32.totalorder %s903_s21, %s970_s22  ;;  %p976_p2 = scmp.lt.s32.totalorder %s970_s22, %s970_s22 }
 0x2cf   :  { %v1160_v56 = vpop.permute.xlu0 %646  ;;  %v607_v11 = vsel %vm606_vm4, %v1158_v55, %v1152_v52  ;;  %v608_v12 = vsel %vm606_vm4, %v1150_v50, %v1158_v55 }
 0x2d0   :  { %v635_v36 = vmul.f32 %v627_v20, %v607_v11  ;;  %v634_v52 = vmul.f32 %v623_v19, %v608_v12  ;;  %v637_v19 = vadd.f32 %v633_v41, %v595_v49  ;;  %p977_p3 = por %p976_p2, %p975_p1 }
 0x2d2   :  { %v1162_v57 = vpop.permute.xlu1 %640  ;;  %v639_v12 = vadd.f32 %v635_v36, %v597_v6  ;;  %p978_p4 = pnand %p977_p3, %p971_p0 }
 0x2d3   :  { %v1164_v59 = vpop.permute.xlu0 %684  ;;  %v652_v15 = vsel %vm648_vm5, %v1160_v56, %v1162_v57  ;;  %v651_v27 = vsel %vm648_vm5, %v1162_v57, %v1156_v54 }
 0x2d4   :  { %v674_v20 = vmul.f32 %v657_v22, %v652_v15  ;;  %v638_v22 = vadd.f32 %v634_v52, %v596_v29 }
 0x2d6   :  { %v1166_v60 = vpop.permute.xlu1 %644 }
 0x2d7   :  { %v1168_v62 = vpop.permute.xlu0 %688  ;;  %v649_v50 = vsel %vm648_vm5, %v1166_v60, %v1160_v56  ;;  %v650_v47 = vsel %vm648_vm5, %v1156_v54, %v1166_v60 }
 0x2d8   :  { %v677_v61 = vmul.f32 %v669_v24, %v649_v50  ;;  %v675_v24 = vmul.f32 %v661_v3, %v651_v27 }
 0x2da   :  { %v1170_v63 = vpop.permute.xlu1 %682  ;;  %v681_v43 = vadd.f32 %v677_v61, %v639_v12  ;;  %v679_v50 = vadd.f32 %v675_v24, %v637_v19  ;;  %v871_v61 = vrot.slane %v1306_v53, %v1178_v4  ;;  %v1488_v12 = vrot.slane %v1240_v26, %v1185_v7 }
 0x2db   :  { %v1180_v5 = vpop.permute.xlu0 %726  ;;  %v694_v56 = vsel %vm690_vm6, %v1168_v62, %v1170_v63  ;;  %v693_v54 = vsel %vm690_vm6, %v1170_v63, %v1164_v59 }
 0x2dc   :  { %v716_v17 = vmul.f32 %v699_v32, %v694_v56  ;;  %v678_v32 = vadd.f32 %v674_v20, %v636_v48 }
 0x2de   :  { %v1197_v10 = vpop.permute.xlu1 %686 }
 0x2df   :  { %v1203_v14 = vpop.permute.xlu0 %730  ;;  %v691_v30 = vsel %vm690_vm6, %v1197_v10, %v1168_v62  ;;  %v692_v3 = vsel %vm690_vm6, %v1164_v59, %v1197_v10  ;;  %v717_v59 = vmul.f32 %v703_v31, %v693_v54  ;;  %v720_v10 = vadd.f32 %v716_v17, %v678_v32 }
 0x2e0   :  { %v719_v60 = vmul.f32 %v711_v34, %v691_v30  ;;  %v718_v41 = vmul.f32 %v707_v33, %v692_v3  ;;  %v1490_v32 = vrot.slane %v1264_v40, %v1185_v7 }
 0x2e1   :  { %v721_v27 = vadd.f32 %v717_v59, %v679_v50 }
 0x2e2   :  { %v1235_v25 = vpop.permute.xlu1 %724  ;;  %v723_v42 = vadd.f32 %v719_v60, %v681_v43  ;;  %v1491_v43 = vrot.slane %v1306_v53, %v1176_v2 }
 0x2e3   :  { %v1250_v35 = vpop.permute.xlu0 %768  ;;  %v735_v57 = vsel %vm732_vm7, %v1235_v25, %v1180_v5  ;;  %v736_v28 = vsel %vm732_vm7, %v1203_v14, %v1235_v25  ;;  %v676_v25 = vmul.f32 %v665_v23, %v650_v47  ;;  %v1487_v47 = vrot.slane %v1240_v26, %v1178_v4 }
 0x2e4   :  { %v758_v63 = vmul.f32 %v741_v37, %v735_v57  ;;  %v761_v34 = vmul.f32 %v753_v38, %v736_v28 }
 0x2e6   :  { %v1276_v46 = vpop.permute.xlu1 %728  ;;  %v762_v18 = vadd.f32 %v758_v63, %v720_v10  ;;  %v765_v33 = vadd.f32 %v761_v34, %v723_v42 }
 0x2e7   :  { %v1293_v51 = vpop.permute.xlu0 %772  ;;  %v733_v37 = vsel %vm732_vm7, %v1276_v46, %v1203_v14  ;;  %v734_v38 = vsel %vm732_vm7, %v1180_v5, %v1276_v46  ;;  %v680_v14 = vadd.f32 %v676_v25, %v638_v22 }
 0x2e8   :  { %v759_v46 = vmul.f32 %v745_v39, %v734_v38  ;;  %v760_v17 = vmul.f32 %v1485_v45, %v733_v37  ;;  %v1486_v39 = vrot.slane %v1264_v40, %v1176_v2 }
 0x2e9   :  { %v722_v21 = vadd.f32 %v718_v41, %v680_v14 }
 0x2ea   :  { %v767_v55 = vpop.permute.xlu1 %766  ;;  %v763_v19 = vadd.f32 %v759_v46, %v721_v27 }
 0x2eb   :  { %v1326_v13 = vpop.permute.xlu0 %810  ;;  %v777_v36 = vsel %vm774_vm8, %v767_v55, %v1250_v35  ;;  %v778_v9 = vsel %vm774_vm8, %v1293_v51, %v767_v55  ;;  %v764_v48 = vadd.f32 %v760_v17, %v722_v21 }
 0x2ec   :  { %v800_v55 = vmul.f32 %v783_v44, %v777_v36  ;;  %v803_v5 = vmul.f32 %v795_v58, %v778_v9 }
 0x2ee   :  { %v771_v11 = vpop.permute.xlu1 %770  ;;  %v804_v30 = vadd.f32 %v800_v55, %v762_v18  ;;  %v807_v29 = vadd.f32 %v803_v5, %v765_v33 }
 0x2ef   :  { %v815_v62 = vpop.permute.xlu0 %814  ;;  %v775_v49 = vsel %vm774_vm8, %v771_v11, %v1293_v51  ;;  %v776_v44 = vsel %vm774_vm8, %v1250_v35, %v771_v11  ;;  %v875_v51 = vrot.slane %v1306_v53, %v1185_v7 }
 0x2f0   :  { %v801_v11 = vmul.f32 %v1487_v47, %v776_v44  ;;  %v802_v57 = vmul.f32 %v1488_v12, %v775_v49 }
 0x2f2   :  { %v809_v23 = vpop.permute.xlu1 %808  ;;  %v805_v63 = vadd.f32 %v801_v11, %v763_v19  ;;  %v806_v34 = vadd.f32 %v802_v57, %v764_v48 }
 0x2f3   :  { %v853_v52 = vpop.permute.xlu0 %852  ;;  %v819_v31 = vsel %vm816_vm9, %v809_v23, %v1326_v13  ;;  %v820_v15 = vsel %vm816_vm9, %v815_v62, %v809_v23 }
 0x2f4   :  { %v842_v58 = vmul.f32 %v825_v8, %v819_v31  ;;  %v845_v56 = vmul.f32 %v1486_v39, %v820_v15 }
 0x2f6   :  { %v813_v6 = vpop.permute.xlu1 %812  ;;  %v846_v22 = vadd.f32 %v842_v58, %v804_v30  ;;  %v849_v24 = vadd.f32 %v845_v56, %v807_v29 }
 0x2f7   :  { %v857_v20 = vpop.permute.xlu0 %856  ;;  %v817_v35 = vsel %vm816_vm9, %v813_v6, %v815_v62  ;;  %v818_v8 = vsel %vm816_vm9, %v1326_v13, %v813_v6  ;;  %v1489_v13 = vrot.slane %v1264_v40, %v1178_v4 }
 0x2f8   :  { %v844_v25 = vmul.f32 %v1490_v32, %v817_v35 }
 0x2f9   :  { %v843_v60 = vmul.f32 %v1489_v13, %v818_v8 }
 0x2fa   :  { %v851_v28 = vpop.permute.xlu1 %850  ;;  %v848_v1 = vadd.f32 %v844_v25, %v806_v34 }
 0x2fb   :  { %v861_v62 = vsel %vm858_vm10, %v851_v28, %v853_v52  ;;  %v862_v54 = vsel %vm858_vm10, %v857_v20, %v851_v28  ;;  %v847_v40 = vadd.f32 %v843_v60, %v805_v63 }
 0x2fc   :  { %v884_v26 = vmul.f32 %v867_v16, %v861_v62  ;;  %v887_v3 = vmul.f32 %v1491_v43, %v862_v54 }
 0x2fe   :  { %v888_v36 = vadd.f32 %v884_v26, %v846_v22  ;;  %v891_v9 = vadd.f32 %v887_v3, %v849_v24  ;;  %v855_v23 = vpop.permute.xlu1 %854 }
 0x2ff   :  { %v859_v4 = vsel %vm858_vm10, %v855_v23, %v857_v20  ;;  %v860_v7 = vsel %vm858_vm10, %v853_v52, %v855_v23 }
 0x300   :  { %892 = vst [vmem:[#allocation2] sm:$0xff] %v888_v36  ;;  %895 = vst [vmem:[#allocation2 + $0x18] sm:$0xff] %v891_v9  ;;  %v885_v16 = vmul.f32 %v871_v61, %v860_v7  ;;  %v886_v2 = vmul.f32 %v875_v51, %v859_v4 }
 0x302   :  { %v889_v53 = vadd.f32 %v885_v16, %v847_v40  ;;  %v890_v59 = vadd.f32 %v886_v2, %v848_v1 }
 0x304   :  { %893 = vst [vmem:[#allocation2 + $0x8] sm:$0xff] %v889_v53  ;;  %894 = vst [vmem:[#allocation2 + $0x10] sm:$0xff] %v890_v59 }
 0x305   :  { %981 = shalt.err (!%p978_p4)
}
 0x306   :  { %s982_s24 = scalar_lea.hbm %s1484_s5, 512 }
 0x307   :  { %p983_p5 = scmp.ne.s32.totalorder %s1484_s5, %s982_s24  ;;  %p986_p6 = scmp.lt.u32.totalorder %s982_s24, %s1484_s5 }
 0x309   :  { %p988_p7 = pnand %p986_p6, %p983_p5 }
 0x30b   :  { %991 = shalt.err (!%p988_p7)
}
 0x30c   :  { %905 = dma.vmem_to_hbm [thread:$0]  %s903_s21, 512, %s1484_s5, [#allocation3]  }
 0x30d   :  { %992 = dma.done.wait [#allocation3], 512  }
 0x30e   :  { %993 = vsyncadd [#allocation3], 4294966784 }
 0x30f   :  { %909 = vsyncpa [#allocation3], 1 }

</bundles_post_ra>
